<compile_context>
chip_gen: v7x
topology: tpu7x:2x2x1
jax: 0.10.0
libtpu: 0.0.40
codegen_flags: <defaults>
</compile_context>

<pallas_src>
import math
import functools

import jax
import jax.numpy as jnp
from jax.experimental import pallas as pl
from jax.experimental.pallas import tpu as pltpu


def _rotate_swap(t, head_dim):
    """swap(t) = concat([t[half:], t[:half]]); with the sign-folded sin table
    this equals rotate_half(t) (an XLU lane-rotate when hd is lane-aligned)."""
    half = head_dim // 2
    if head_dim % 128 == 0:
        return pltpu.roll(t, shift=half, axis=1)
    return jnp.concatenate([t[:, half:], t[:, :half]], axis=-1)


# ---------------------------------------------------------------------------
# Prologue: K/V projection + K-RoPE, once per (batch, kv_head, key_tile).
# ---------------------------------------------------------------------------
def _kv_proj_kernel(x_ref, wkv_ref, cos_ref, sin_ref, k_ref, v_ref, *, head_dim):
    x = x_ref[0]                                                 # (tk, dim) bf16
    # Fused Wk|Wv matmul: N = 2*hd fills the MXU better than two hd matmuls.
    kv = jnp.dot(x, wkv_ref[0], preferred_element_type=jnp.float32)
    k = kv[:, :head_dim]
    v = kv[:, head_dim:]
    k = k * cos_ref[...] + _rotate_swap(k, head_dim) * sin_ref[...]
    k_ref[0, 0] = k.astype(k_ref.dtype)
    v_ref[0, 0] = v.astype(v_ref.dtype)


# ---------------------------------------------------------------------------
# Flash GQA kernel: grid = (batch, q_tiles, kv_heads, k_tiles).
# ---------------------------------------------------------------------------
def _gqa_flash_kernel(x_ref, wq_ref, wo_ref, cos_ref, sin_ref, k_ref, v_ref,
                      *rest, head_dim, n_rep, tq, tk, causal, has_mask, scale):
    if has_mask:
        mask_ref, rest = rest[0], rest[1:]
    else:
        mask_ref = None
    o_ref, acc_out, q_buf, m_scr, l_scr, acc_attn = rest

    qi = pl.program_id(1)
    kv = pl.program_id(2)
    ki = pl.program_id(3)
    n_kv = pl.num_programs(2)
    n_k = pl.num_programs(3)

    # ---- once per (batch, q-tile): zero the output accumulator -------------
    @pl.when(jnp.logical_and(kv == 0, ki == 0))
    def _():
        acc_out[...] = jnp.zeros_like(acc_out)

    # ---- once per (q-tile, kv-group): project + RoPE the whole Q group -----
    @pl.when(ki == 0)
    def _():
        xq = x_ref[0]                                            # (tq, dim) bf16
        # One wide matmul for all n_rep heads of the group (N = n_rep*hd).
        qg = jnp.dot(xq, wq_ref[0], preferred_element_type=jnp.float32)
        cos = cos_ref[...]                                       # (tq, hd) f32
        sin = sin_ref[...]                                       # sign-folded sin
        for r in range(n_rep):                                   # amortized (ki==0 only)
            qr = qg[:, r * head_dim:(r + 1) * head_dim]
            qr = qr * cos + _rotate_swap(qr, head_dim) * sin
            # fold 1/sqrt(head_dim) into q (cheaper than scaling (M, tk) scores)
            q_buf[r * tq:(r + 1) * tq, :] = (qr * scale).astype(q_buf.dtype)
        m_scr[...] = jnp.full_like(m_scr, -jnp.inf)
        l_scr[...] = jnp.zeros_like(l_scr)
        acc_attn[...] = jnp.zeros_like(acc_attn)

    # ---- per key tile: ONE scores matmul + ONE PV matmul for the group -----
    def process_tile():
        k = k_ref[0, 0]                                          # (tk, hd) bf16 (RoPE'd)
        v = v_ref[0, 0]                                          # (tk, hd) bf16
        # Scores for all n_rep heads at once: M = n_rep*tq rows, K pushed once.
        s = jax.lax.dot_general(q_buf[...], k, (((1,), (1,)), ((), ())),
                                preferred_element_type=jnp.float32)  # (M, tk)
        if causal:
            row = jax.lax.broadcasted_iota(jnp.int32, (tq, tk), 0) + qi * tq
            col = jax.lax.broadcasted_iota(jnp.int32, (tq, tk), 1) + ki * tk
            bias = jnp.where(row >= col, 0.0, -1e9)              # (tq, tk) f32
        elif has_mask:
            bias = jnp.where(mask_ref[...].astype(jnp.int32) != 0, 0.0, -1e9)
        else:
            bias = None
        if bias is not None:
            if n_rep > 1:
                bias = jnp.concatenate([bias] * n_rep, axis=0)   # (M, tk)
            s = s + bias
        m_prev = m_scr[...]
        m_new = jnp.maximum(m_prev, jnp.max(s, axis=-1, keepdims=True))
        alpha = jnp.exp(m_prev - m_new)
        # TODO(synk): v6e/v7x have a bf16 EUP path; casting (s - m_new) to bf16
        # before exp ~doubles exp throughput there (keep f32 on v5e).
        p = jnp.exp(s - m_new)
        l_scr[...] = alpha * l_scr[...] + jnp.sum(p, axis=-1, keepdims=True)
        acc_attn[...] = alpha * acc_attn[...] + jnp.dot(
            p.astype(jnp.bfloat16), v, preferred_element_type=jnp.float32)
        m_scr[...] = m_new

    if causal:
        # Fully-masked key tiles: compute skipped here, DMA skipped via the
        # clamped key-side index_maps in the wrapper.
        pl.when(ki * tk <= qi * tq + (tq - 1))(process_tile)
    else:
        process_tile()

    # ---- last key tile: normalize, project through the Wo group ------------
    @pl.when(ki == n_k - 1)
    def _():
        inv_l = pl.reciprocal(l_scr[...], approx=True)           # EUP slot, ~free
        out_g = (acc_attn[...] * inv_l).astype(jnp.bfloat16)     # (M, hd)
        res = acc_out[...]
        for r in range(n_rep):
            res = res + jnp.dot(
                out_g[r * tq:(r + 1) * tq, :],
                wo_ref[0, r * head_dim:(r + 1) * head_dim, :],
                preferred_element_type=jnp.float32)
        acc_out[...] = res

    # ---- last (kv-group, key-tile): single store of the output block -------
    @pl.when(jnp.logical_and(kv == n_kv - 1, ki == n_k - 1))
    def _():
        o_ref[0] = acc_out[...].astype(o_ref.dtype)


def grouped_query_attention(x, wq, wk, wv, wo, cos, sin, num_heads,
                            num_kv_heads, attention_mask=None, causal=False,
                            block_q=256, block_k=256):
    """Fused GQA forward matching the PyTorch GroupedQueryAttention module.

    x: (B, S, dim); wq/wo: (dim, dim); wk/wv: (num_kv_heads*hd, dim)
    (nn.Linear weights, [out, in], no bias). cos/sin: (S, hd) RoPE tables.
    attention_mask: optional (S, S); entries == 0 are masked out.
    causal=True generates the causal mask in-kernel (mask arg ignored).
    """
    B, S, dim = x.shape
    assert dim % num_heads == 0 and num_heads % num_kv_heads == 0
    hd = dim // num_heads
    assert hd % 2 == 0
    n_rep = num_heads // num_kv_heads
    Hkv = num_kv_heads
    G = n_rep * hd
    half = hd // 2
    out_dtype = x.dtype

    tq = min(block_q, S)
    tk = min(block_k, S)
    assert S % tq == 0 and S % tk == 0
    nq, nk = S // tq, S // tk
    M = n_rep * tq

    # --- one-time weight re-layout: grouped, pre-transposed per KV head -----
    wq_g = wq.T.reshape(dim, Hkv, G).transpose(1, 0, 2)            # (Hkv,dim,G)
    wk_t = wk.T.reshape(dim, Hkv, hd)
    wv_t = wv.T.reshape(dim, Hkv, hd)
    wkv_g = jnp.concatenate([wk_t, wv_t], axis=-1).transpose(1, 0, 2)  # (Hkv,dim,2hd)
    wo_g = wo.T.reshape(Hkv, G, dim)                               # (Hkv,G,dim)

    # bf16 MXU operands; softmax / accumulation stay f32 in-kernel.
    x_bf = x.astype(jnp.bfloat16)
    wq_g = wq_g.astype(jnp.bfloat16)
    wkv_g = wkv_g.astype(jnp.bfloat16)
    wo_g = wo_g.astype(jnp.bfloat16)

    cos_f = cos.astype(jnp.float32)
    sin_f = sin.astype(jnp.float32)
    # Fold rotate_half's sign into sin: rotate_half(t)*sin == swap(t)*sin_rot.
    sin_rot = jnp.concatenate([-sin_f[:, :half], sin_f[:, half:]], axis=-1)

    # ---- prologue: k = RoPE(x @ Wk), v = x @ Wv as bf16 (B, Hkv, S, hd) -----
    kv_flops = 2 * B * S * dim * Hkv * 2 * hd
    kv_bytes = (B * S * dim * 2 * Hkv + Hkv * dim * 2 * hd * 2
                + 2 * B * Hkv * S * hd * 2)
    k_pre, v_pre = pl.pallas_call(
        functools.partial(_kv_proj_kernel, head_dim=hd),
        out_shape=(jax.ShapeDtypeStruct((B, Hkv, S, hd), jnp.bfloat16),
                   jax.ShapeDtypeStruct((B, Hkv, S, hd), jnp.bfloat16)),
        grid=(B, Hkv, nk),
        in_specs=[
            pl.BlockSpec((1, tk, dim), lambda b, h, ki: (b, ki, 0)),
            pl.BlockSpec((1, dim, 2 * hd), lambda b, h, ki: (h, 0, 0)),
            pl.BlockSpec((tk, hd), lambda b, h, ki: (ki, 0)),
            pl.BlockSpec((tk, hd), lambda b, h, ki: (ki, 0)),
        ],
        out_specs=(pl.BlockSpec((1, 1, tk, hd), lambda b, h, ki: (b, h, ki, 0)),
                   pl.BlockSpec((1, 1, tk, hd), lambda b, h, ki: (b, h, ki, 0))),
        compiler_params=pltpu.CompilerParams(
            dimension_semantics=("parallel", "parallel", "parallel")),
        cost_estimate=pl.CostEstimate(flops=kv_flops, transcendentals=0,
                                      bytes_accessed=kv_bytes),
    )(x_bf, wkv_g, cos_f, sin_rot)

    has_mask = (attention_mask is not None) and (not causal)
    if has_mask and (tq != S or tk != S):
        # int8 mask tiles must respect the (32, 128) native tiling when the
        # block does not cover the full (S, S) mask.
        assert tq % 32 == 0 and tk % 128 == 0, \
            "partial mask tiles need block_q % 32 == 0 and block_k % 128 == 0"

    # Causal: clamp key-side block indices to the last needed tile so fully
    # masked tiles re-use the previous block (Pallas only DMAs on index change).
    if causal:
        def kv_idx(b, qi, kvh, ki):
            return (b, kvh, jnp.minimum(ki, (qi * tq + tq - 1) // tk), 0)
    else:
        def kv_idx(b, qi, kvh, ki):
            return (b, kvh, ki, 0)

    in_specs = [
        pl.BlockSpec((1, tq, dim), lambda b, qi, kvh, ki: (b, qi, 0)),   # x (q)
        pl.BlockSpec((1, dim, G), lambda b, qi, kvh, ki: (kvh, 0, 0)),   # Wq group
        pl.BlockSpec((1, G, dim), lambda b, qi, kvh, ki: (kvh, 0, 0)),   # Wo group
        pl.BlockSpec((tq, hd), lambda b, qi, kvh, ki: (qi, 0)),          # cos (q)
        pl.BlockSpec((tq, hd), lambda b, qi, kvh, ki: (qi, 0)),          # sin (q)
        pl.BlockSpec((1, 1, tk, hd), kv_idx),                            # K tiles
        pl.BlockSpec((1, 1, tk, hd), kv_idx),                            # V tiles
    ]
    args = [x_bf, wq_g, wo_g, cos_f, sin_rot, k_pre, v_pre]
    if has_mask:
        in_specs.append(pl.BlockSpec((tq, tk), lambda b, qi, kvh, ki: (qi, ki)))
        args.append(attention_mask.astype(jnp.int8))      # 4x less mask traffic

    kern = functools.partial(
        _gqa_flash_kernel, head_dim=hd, n_rep=n_rep, tq=tq, tk=tk,
        causal=causal, has_mask=has_mask, scale=1.0 / math.sqrt(hd))

    # Explicit VMEM budget: double-buffered streams + persistent scratch.
    stream = (tq * dim * 2 + dim * G * 2 + G * dim * 2 + 2 * tq * hd * 4
              + 2 * tk * hd * 2 + tq * dim * jnp.dtype(out_dtype).itemsize)
    if has_mask:
        stream += tq * tk
    scratch = tq * dim * 4 + M * hd * 2 + 2 * M * 4 + M * hd * 4
    vmem_limit = int(min(100 << 20, max(32 << 20, 2 * (2 * stream + scratch))))

    flops = 4 * B * S * dim * dim + 4 * B * num_heads * S * S * hd
    bytes_accessed = (B * S * dim * 2                              # x (q side)
                      + B * nq * Hkv * 2 * dim * G * 2             # Wq/Wo streams
                      + B * nq * Hkv * S * hd * 2 * 2              # K/V streams
                      + B * S * dim * jnp.dtype(out_dtype).itemsize)

    return pl.pallas_call(
        kern,
        out_shape=jax.ShapeDtypeStruct((B, S, dim), out_dtype),
        grid=(B, nq, Hkv, nk),
        in_specs=in_specs,
        out_specs=pl.BlockSpec((1, tq, dim), lambda b, qi, kvh, ki: (b, qi, 0)),
        scratch_shapes=[
            pltpu.VMEM((tq, dim), jnp.float32),     # output accumulator
            pltpu.VMEM((M, hd), jnp.bfloat16),      # q group (flattened M)
            pltpu.VMEM((M, 1), jnp.float32),        # running max
            pltpu.VMEM((M, 1), jnp.float32),        # running denominator
            pltpu.VMEM((M, hd), jnp.float32),       # unnormalized attn
        ],
        compiler_params=pltpu.CompilerParams(
            dimension_semantics=("parallel", "parallel",
                                 "arbitrary", "arbitrary"),
            vmem_limit_bytes=vmem_limit),
        cost_estimate=pl.CostEstimate(flops=flops,
                                      transcendentals=B * num_heads * S * S,
                                      bytes_accessed=bytes_accessed),
    )(*args)


def _reference(x, wq, wk, wv, wo, cos, sin, num_heads, num_kv_heads, mask=None):
    """Pure-JAX f32 reference mirroring the PyTorch forward semantics."""
    B, S, dim = x.shape
    hd = dim // num_heads
    n_rep = num_heads // num_kv_heads
    q = (x @ wq.T).reshape(B, S, num_heads, hd).transpose(0, 2, 1, 3)
    k = (x @ wk.T).reshape(B, S, num_kv_heads, hd).transpose(0, 2, 1, 3)
    v = (x @ wv.T).reshape(B, S, num_kv_heads, hd).transpose(0, 2, 1, 3)
    k = jnp.repeat(k, n_rep, axis=1)   # repeat_interleave along head axis
    v = jnp.repeat(v, n_rep, axis=1)

    def rot(t):
        h = hd // 2
        return jnp.concatenate([-t[..., h:], t[..., :h]], axis=-1)

    q = q * cos + rot(q) * sin
    k = k * cos + rot(k) * sin
    s = jnp.einsum('bhqe,bhke->bhqk', q, k) / math.sqrt(hd)
    if mask is not None:
        s = jnp.where(mask == 0, -1e9, s)
    p = jax.nn.softmax(s, axis=-1)
    o = jnp.einsum('bhqk,bhke->bhqe', p, v)
    o = o.transpose(0, 2, 1, 3).reshape(B, S, dim)
    return o @ wo.T


if __name__ == "__main__":
    def rope_tables(S, hd):
        inv_freq = 1.0 / (10000.0 ** (jnp.arange(0, hd, 2, dtype=jnp.float32) / hd))
        pos = jnp.arange(S, dtype=jnp.float32)
        freqs = jnp.einsum('s,f->sf', pos, inv_freq)
        emb = jnp.concatenate([freqs, freqs], axis=-1)
        return jnp.cos(emb), jnp.sin(emb)

    def make_weights(key, dim, hkv, hd):
        kq, kk, kv_, ko = jax.random.split(key, 4)
        wq = 0.05 * jax.random.normal(kq, (dim, dim), jnp.float32)
        wk = 0.05 * jax.random.normal(kk, (hkv * hd, dim), jnp.float32)
        wv = 0.05 * jax.random.normal(kv_, (hkv * hd, dim), jnp.float32)
        wo = 0.05 * jax.random.normal(ko, (dim, dim), jnp.float32)
        return wq, wk, wv, wo

    key = jax.random.PRNGKey(0)
    kx, kw, kx2, kx3 = jax.random.split(key, 4)

    # ---- case 1: S fits one tile; causal / explicit-mask / no-mask paths ----
    num_heads, num_kv_heads, dim = 4, 2, 32
    hd = dim // num_heads                              # 8
    B, S = 2, 8
    wq, wk, wv, wo = make_weights(kw, dim, num_kv_heads, hd)
    x = jax.random.normal(kx, (B, S, dim), jnp.float32)
    cos, sin = rope_tables(S, hd)
    tril = jnp.tril(jnp.ones((S, S), jnp.int32))

    out_causal = jax.block_until_ready(grouped_query_attention(
        x, wq, wk, wv, wo, cos, sin, num_heads, num_kv_heads, causal=True))
    ref_causal = _reference(x, wq, wk, wv, wo, cos, sin, num_heads,
                            num_kv_heads, mask=tril)
    assert out_causal.shape == (B, S, dim)
    assert jnp.allclose(out_causal, ref_causal, rtol=2e-2, atol=2e-2), \
        f"causal max abs err {jnp.max(jnp.abs(out_causal - ref_causal))}"

    out_mask = jax.block_until_ready(grouped_query_attention(
        x, wq, wk, wv, wo, cos, sin, num_heads, num_kv_heads,
        attention_mask=tril))
    assert jnp.allclose(out_mask, ref_causal, rtol=2e-2, atol=2e-2), \
        f"mask max abs err {jnp.max(jnp.abs(out_mask - ref_causal))}"

    out_none = jax.block_until_ready(grouped_query_attention(
        x, wq, wk, wv, wo, cos, sin, num_heads, num_kv_heads))
    ref_none = _reference(x, wq, wk, wv, wo, cos, sin, num_heads, num_kv_heads)
    assert jnp.allclose(out_none, ref_none, rtol=2e-2, atol=2e-2), \
        f"no-mask max abs err {jnp.max(jnp.abs(out_none - ref_none))}"

    # ---- case 2: multi q/k tiles -> online softmax + causal DMA clamp ------
    S2 = 32
    x2 = jax.random.normal(kx2, (B, S2, dim), jnp.float32)
    cos2, sin2 = rope_tables(S2, hd)
    tril2 = jnp.tril(jnp.ones((S2, S2), jnp.int32))
    out2 = jax.block_until_ready(grouped_query_attention(
        x2, wq, wk, wv, wo, cos2, sin2, num_heads, num_kv_heads,
        causal=True, block_q=16, block_k=16))
    ref2 = _reference(x2, wq, wk, wv, wo, cos2, sin2, num_heads,
                      num_kv_heads, mask=tril2)
    assert jnp.allclose(out2, ref2, rtol=2e-2, atol=2e-2), \
        f"tiled causal max abs err {jnp.max(jnp.abs(out2 - ref2))}"

    # ---- case 3: head_dim = 128 -> pltpu.roll RoPE path, multi-tile causal --
    num_heads3, num_kv_heads3, dim3 = 4, 2, 512
    hd3 = dim3 // num_heads3                           # 128
    S3 = 32
    wq3, wk3, wv3, wo3 = make_weights(jax.random.fold_in(kw, 3),
                                      dim3, num_kv_heads3, hd3)
    x3 = jax.random.normal(kx3, (B, S3, dim3), jnp.float32)
    cos3, sin3 = rope_tables(S3, hd3)
    tril3 = jnp.tril(jnp.ones((S3, S3), jnp.int32))
    out3 = jax.block_until_ready(grouped_query_attention(
        x3, wq3, wk3, wv3, wo3, cos3, sin3, num_heads3, num_kv_heads3,
        causal=True, block_q=16, block_k=16))
    ref3 = _reference(x3, wq3, wk3, wv3, wo3, cos3, sin3, num_heads3,
                      num_kv_heads3, mask=tril3)
    assert jnp.allclose(out3, ref3, rtol=5e-2, atol=5e-2), \
        f"hd128 causal max abs err {jnp.max(jnp.abs(out3 - ref3))}"

    print("KERNEL_OK")
</pallas_src>

<mosaic_0001>
module attributes {stable_mosaic.version = 11 : i64} {
  func.func @_kv_proj_kernel(%arg0: i32, %arg1: i32, %arg2: i32, %arg3: memref<1x8x32xbf16, #tpu.memory_space<vmem>>, %arg4: memref<1x32x16xbf16, #tpu.memory_space<vmem>>, %arg5: memref<8x8xf32, #tpu.memory_space<vmem>>, %arg6: memref<8x8xf32, #tpu.memory_space<vmem>>, %arg7: memref<1x1x8x8xbf16, #tpu.memory_space<vmem>>, %arg8: memref<1x1x8x8xbf16, #tpu.memory_space<vmem>>) attributes {dimension_semantics = [#tpu.dimension_semantics<parallel>, #tpu.dimension_semantics<parallel>, #tpu.dimension_semantics<parallel>], iteration_bounds = array<i64: 2, 2, 1>, scalar_prefetch = 0 : i64, scratch_operands = 0 : i64, tpu.core_type = #tpu.core_type<tc>, window_params = [{transform_indices = @transform_0, window_bounds = array<i64: 1, 8, 32>}, {transform_indices = @transform_1, window_bounds = array<i64: 1, 32, 16>}, {transform_indices = @transform_2, window_bounds = array<i64: 8, 8>}, {transform_indices = @transform_3, window_bounds = array<i64: 8, 8>}, {transform_indices = @transform_4, window_bounds = array<i64: 1, 1, 8, 8>}, {transform_indices = @transform_5, window_bounds = array<i64: 1, 1, 8, 8>}]} {
    %c0 = arith.constant 0 : index
    %c0_0 = arith.constant 0 : index
    %c0_1 = arith.constant 0 : index
    %0 = vector.load %arg3[%c0, %c0_0, %c0_1] : memref<1x8x32xbf16, #tpu.memory_space<vmem>>, vector<1x8x32xbf16>
    %1 = vector.shape_cast %0 : vector<1x8x32xbf16> to vector<8x32xbf16>
    %c0_2 = arith.constant 0 : index
    %c0_3 = arith.constant 0 : index
    %c0_4 = arith.constant 0 : index
    %2 = vector.load %arg4[%c0_2, %c0_3, %c0_4] : memref<1x32x16xbf16, #tpu.memory_space<vmem>>, vector<1x32x16xbf16>
    %3 = vector.shape_cast %2 : vector<1x32x16xbf16> to vector<32x16xbf16>
    %cst = arith.constant dense<0.000000e+00> : vector<8x16xf32>
    %4 = tpu.matmul %1, %3, %cst {dimension_numbers = #tpu.dot_dimension_numbers<[1], [0], [0], [1], [0, 0, 1, 1], [], []>} : vector<8x32xbf16>, vector<32x16xbf16>, vector<8x16xf32> -> vector<8x16xf32>
    %5 = vector.extract_strided_slice %4 {offsets = [0, 0], sizes = [8, 8], strides = [1, 1]} : vector<8x16xf32> to vector<8x8xf32>
    %6 = vector.extract_strided_slice %4 {offsets = [0, 8], sizes = [8, 8], strides = [1, 1]} : vector<8x16xf32> to vector<8x8xf32>
    %c0_5 = arith.constant 0 : index
    %c0_6 = arith.constant 0 : index
    %7 = vector.load %arg5[%c0_5, %c0_6] : memref<8x8xf32, #tpu.memory_space<vmem>>, vector<8x8xf32>
    %8 = arith.mulf %5, %7 : vector<8x8xf32>
    %9 = vector.extract_strided_slice %5 {offsets = [0, 4], sizes = [8, 4], strides = [1, 1]} : vector<8x8xf32> to vector<8x4xf32>
    %10 = vector.extract_strided_slice %5 {offsets = [0, 0], sizes = [8, 4], strides = [1, 1]} : vector<8x8xf32> to vector<8x4xf32>
    %11 = tpu.concatenate %9, %10 in 1 : vector<8x4xf32>, vector<8x4xf32> -> vector<8x8xf32>
    %c0_7 = arith.constant 0 : index
    %c0_8 = arith.constant 0 : index
    %12 = vector.load %arg6[%c0_7, %c0_8] : memref<8x8xf32, #tpu.memory_space<vmem>>, vector<8x8xf32>
    %13 = arith.mulf %11, %12 : vector<8x8xf32>
    %14 = arith.addf %8, %13 : vector<8x8xf32>
    %15 = arith.truncf %14 : vector<8x8xf32> to vector<8x8xbf16>
    %c0_9 = arith.constant 0 : index
    %c0_10 = arith.constant 0 : index
    %c0_11 = arith.constant 0 : index
    %c0_12 = arith.constant 0 : index
    %16 = vector.load %arg7[%c0_9, %c0_10, %c0_11, %c0_12] : memref<1x1x8x8xbf16, #tpu.memory_space<vmem>>, vector<1x1x8x8xbf16>
    %17 = vector.shape_cast %16 : vector<1x1x8x8xbf16> to vector<8x8xbf16>
    %18 = vector.shape_cast %15 : vector<8x8xbf16> to vector<1x1x8x8xbf16>
    tpu.vector_store %arg7[%c0_9, %c0_10, %c0_11, %c0_12], %18 {strides = array<i32>} : memref<1x1x8x8xbf16, #tpu.memory_space<vmem>>, vector<1x1x8x8xbf16>,
    %19 = arith.truncf %6 : vector<8x8xf32> to vector<8x8xbf16>
    %c0_13 = arith.constant 0 : index
    %c0_14 = arith.constant 0 : index
    %c0_15 = arith.constant 0 : index
    %c0_16 = arith.constant 0 : index
    %20 = vector.load %arg8[%c0_13, %c0_14, %c0_15, %c0_16] : memref<1x1x8x8xbf16, #tpu.memory_space<vmem>>, vector<1x1x8x8xbf16>
    %21 = vector.shape_cast %20 : vector<1x1x8x8xbf16> to vector<8x8xbf16>
    %22 = vector.shape_cast %19 : vector<8x8xbf16> to vector<1x1x8x8xbf16>
    tpu.vector_store %arg8[%c0_13, %c0_14, %c0_15, %c0_16], %22 {strides = array<i32>} : memref<1x1x8x8xbf16, #tpu.memory_space<vmem>>, vector<1x1x8x8xbf16>,
    return
  }
  func.func @transform_0(%arg0: i32, %arg1: i32, %arg2: i32) -> (i32, i32, i32) {
    %c0_i32 = arith.constant 0 : i32
    %c0_i32_0 = arith.constant 0 : i32
    return %arg0, %arg2, %c0_i32 : i32, i32, i32
  }
  func.func @transform_1(%arg0: i32, %arg1: i32, %arg2: i32) -> (i32, i32, i32) {
    %c0_i32 = arith.constant 0 : i32
    %c0_i32_0 = arith.constant 0 : i32
    %c0_i32_1 = arith.constant 0 : i32
    return %arg1, %c0_i32, %c0_i32_0 : i32, i32, i32
  }
  func.func @transform_2(%arg0: i32, %arg1: i32, %arg2: i32) -> (i32, i32) {
    %c0_i32 = arith.constant 0 : i32
    %c0_i32_0 = arith.constant 0 : i32
    return %arg2, %c0_i32 : i32, i32
  }
  func.func @transform_3(%arg0: i32, %arg1: i32, %arg2: i32) -> (i32, i32) {
    %c0_i32 = arith.constant 0 : i32
    %c0_i32_0 = arith.constant 0 : i32
    return %arg2, %c0_i32 : i32, i32
  }
  func.func @transform_4(%arg0: i32, %arg1: i32, %arg2: i32) -> (i32, i32, i32, i32) {
    %c0_i32 = arith.constant 0 : i32
    %c0_i32_0 = arith.constant 0 : i32
    return %arg0, %arg1, %arg2, %c0_i32 : i32, i32, i32, i32
  }
  func.func @transform_5(%arg0: i32, %arg1: i32, %arg2: i32) -> (i32, i32, i32, i32) {
    %c0_i32 = arith.constant 0 : i32
    %c0_i32_0 = arith.constant 0 : i32
    return %arg0, %arg1, %arg2, %c0_i32 : i32, i32, i32, i32
  }
}

</mosaic_0001>

<bundles_post_ra>
// kernel: tpu_custom_call.1
= control target key start
LH: loop header
LB: loop body
LE: loop exit
PB: predicated region body
PF: predicated region fallthrough
CT: control target
= control target key end

     0   :  { %11 = vsyncpa [#allocation3], 0  ;;  %s1082_s0 = inlined_call_operand.vmem [shape: bf16[2,8,32], index: 0, kind: input, shape index: {}]   ;;  %s1083_s1 = inlined_call_operand.vmem [shape: bf16[2,32,16], index: 1, kind: input, shape index: {}]   ;;  %s1084_s2 = inlined_call_operand.vmem [shape: f32[8,8], index: 2, kind: input, shape index: {}]   ;;  %s1085_s3 = inlined_call_operand.vmem [shape: f32[8,8], index: 3, kind: input, shape index: {}]   ;;  %s1086_s4 = inlined_call_operand.hbm [shape: bf16[2,2,8,8], index: 4, kind: output, shape index: {0}]   ;;  %s1087_s5 = inlined_call_operand.hbm [shape: bf16[2,2,8,8], index: 5, kind: output, shape index: {1}]  }
   0x1   :  { %13 = vsyncpa [#allocation3 + $0x1], 0 }
   0x2   :  { %14 = vsyncpa [#allocation5], 0 }
   0x3   :  { %16 = vsyncpa [#allocation5 + $0x1], 0  ;;  %s889_s18 = smov 0   ;;  %s891_s19 = smov 0  }
   0x4   :  { %s893_s20 = smov 0   ;;  %s895_s21 = smov 0  }
   0x5   :  { %s897_s22 = smov 0   ;;  %s899_s23 = smov 0  }
   0x6   :  { %s901_s24 = smov 0   ;;  %s903_s25 = smov 0  }
   0x7 LB: > { %s604_s26 = sadd.s32 4294967295, %s850_s25   ;;  %s605_s27 = sadd.s32 4294967294, %s850_s25   ;;  %s850_s25 = sphi %s903_s25, %s22_s25   ;;  %s846_s24 = sphi %s901_s24, %s1100_s24   ;;  %s842_s23 = sphi %s899_s23, %s1099_s23   ;;  %s838_s22 = sphi %s897_s22, %s1098_s22   ;;  %s834_s21 = sphi %s895_s21, %s1097_s21   ;;  %s830_s20 = sphi %s893_s20, %s1096_s20   ;;  %s826_s19 = sphi %s891_s19, %s1095_s19   ;;  %s822_s18 = sphi %s889_s18, %s1094_s18  }
   0x8   : > { %s37_s28 = sadd.s32 1, %s842_s23  ;;  %s41_s29 = sadd.s32 1, %s846_s24 }
   0x9   : > { %p39_p0 = scmp.ge.s32.totalorder %s37_s28, 2  ;;  %p168_p1 = scmp.ne.s32.totalorder %s830_s20, %s826_s19 }
   0xa   : > { %p169_p2 = scmp.eq.s32.totalorder %s604_s26, 3  ;;  %p174_p5 = scmp.ne.s32.totalorder %s826_s19, %s822_s18 }
   0xb   : > { %s1102_s28 = smov (%p39_p0, %s37_s28), 0  ;;  %s1104_s29 = smov (!%p39_p0, %s41_s29), %s846_s24 }
   0xc   : > { %s152_s30 = ssub.s32 %s842_s23, %s1102_s28  ;;  %p940_p3 = por %p169_p2, %p168_p1 }
   0xd   : > { %p43_p4 = scmp.ge.s32.totalorder %s1104_s29, 2  ;;  %p175_p6 = scmp.eq.s32.totalorder %s605_s27, 3 }
   0xe   : > { %p610_p7 = scmp.ge.s32.totalorder %s850_s25, 1  ;;  %p255_p9 = scmp.lt.s32.totalorder %s850_s25, 5 }
   0xf   : > { %s1106_s29 = smov (%p43_p4, %s1104_s29), 0  ;;  %p949_p8 = por %p175_p6, %p174_p5 }
  0x10   : > { %s151_s8 = ssub.s32 %s846_s24, %s1106_s29  ;;  %s158_s9 = sadd.s32 1, %s830_s20 }
  0x11   : > { %s153_s10 = sor.u32 %s152_s30, %s151_s8  ;;  %p256_p10 = pnand %p610_p7, %p255_p9 }
  0x12   : > { %p156_p11 = scmp.eq.s32.totalorder %s153_s10, 0  ;;  %p310_p12 = scmp.lt.s32.totalorder (!%p256_p10), %s834_s21, 1  ;;  %v852_v0 = vmov (!%p256_p10), 0.0   ;;  %vm853_vm0 = vmmov (!%p256_p10), 0   ;;  %vm341_vm1 = vcmask (!%p256_p10), 261120   ;;  %vm400_vm2 = vcmask (!%p256_p10), 60416  }
  0x13   : > { %259 = sbr.rel (%p256_p10) target bundleno = 407 (0x197), region = 36  ;;  %p303_p13 = scmp.lt.s32.totalorder (!%p256_p10), %s838_s22, 1  ;;  %633 = vmatprep.subr.bf16.mxu0 (!%p256_p10), %v852_v0  ;;  %637 = vmatprep.mubr.msk.bf16.mxu0 (!%p256_p10), %vm853_vm0, %v852_v0  ;;  %vm394_vm3 = vcmask (!%p256_p10), 31744   ;;  %v385_v11 = vld [vmem:[%s1084_s2] sm:$0xff] (!%p256_p10) }
  0x14   : > { %s958_s11 = scalar_select %p156_p11, %s830_s20, %s158_s9  }
  0x15   : > { %s854_s9 = smov (!%p256_p10), 124   ;;  %s855_s10 = smov (!%p256_p10), 120   ;;  %v396_v12 = vld [vmem:[%s1085_s3] sm:$0xff] (!%p256_p10) }
  0x1a   : > { %s311_s12 = scalar_select %p310_p12, %s834_s21, 1 }
  0x1b   : > { %s304_s13 = scalar_select %p303_p13, %s838_s22, 1 }
  0x1c   : > { %s628_s14 = sshll.u32 %s311_s12, 4  ;;  %s856_s12 = smov 4  }
  0x1d   : > { %s314_s17 = scalar_lea.vmem %s1083_s1, %s628_s14  ;;  %s613_s26 = sshll.u32 %s304_s13, 2 }
  0x1e   : > { %v722_v1 = vld [vmem:[%s314_s17] sm:$0xff]   ;;  %v723_v2 = vld [vmem:[%s314_s17 + $0x8] sm:$0xff]   ;;  %s309_s8 = scalar_lea.vmem %s1082_s0, %s613_s26  ;;  %s971_s13 = sand.u32 1, %s826_s19  }
  0x1f   : > { %634 = vmatpush3.bf16.msra.mxu0 %v722_v1  ;;  %v324_v3 = vld [vmem:[%s309_s8] sm:$0xf]  ;;  %s622_s14 = sshll.u32 %s838_s22, 1  ;;  %s1089_s15 = sshll.u32 %s971_s13, 2 }
  0x20   : > { %635 = vmatprep.subr.bf16.mxu0 %v852_v0  ;;  %s976_s16 = sadd.s32 %s834_s21, %s622_s14  ;;  %s302_s26 = scalar_lea.vmem [#allocation4], %s1089_s15 }
  0x21   : > { %s1088_s17 = sshll.u32 %s976_s16, 6  ;;  %s448_s27 = sshll.u32 %s302_s26, 4  ;;  %s988_s27 = int_to_ptr.vmem [resolvable:$true] %s448_s27 }
  0x22   : > { %s416_s14 = scalar_lea.sflag [#allocation5], %s971_s13  ;;  %s724_s30 = scalar_lea.vmem %s988_s27, 64 }
  0x23   : > { %636 = vmatpush3.bf16.msra.mxu0 %v723_v2  ;;  %p725_p0 = scmp.ne.s32.totalorder %s988_s27, %s724_s30  ;;  %s857_s8 = smov [#allocation4]  }
  0x25   : > { %p726_p1 = pnand %p725_p0, %p940_p3 }
  0x26   : > { %638 = vmatmul.mubr.msk.bf16.vlgmr.msra.gmra.mrb[0].mxu0 %vm341_vm1, %v324_v3 }
  0x27   : > { %p727_p2 = pneg %p726_p1 }
  0xf9   : > { %v379_v4 = vpop.f32.mrb[0].mxu0 }
  0xfa   : > { %388 = vrot.lane.b32.xlu0 %v379_v4, %s854_s9  ;;  %v639_v5 = vpop.f32.mrb[1].mxu0  ;;  %v629_v6 = vpack.c.bf16 %v379_v4, %v379_v4  ;;  %s986_s9 = scalar_lea.hbm %s1087_s5, %s1088_s17  ;;  %s728_s17 = sshll.u32 %s857_s8, 4  ;;  %s729_s17 = int_to_ptr.vmem [resolvable:$false] %s728_s17 }
  0xfb   : > { %v382_v7 = vpop.f32.mrb[2].mxu0  ;;  %s730_s15 = scalar_lea.vmem %s729_s17, 128  ;;  %p731_p4 = scmp.lt.s32.totalorder %s988_s27, %s729_s17 }
  0xfc   : > { %406 = vrot.lane.b32.xlu1 %v629_v6, %s855_s10  ;;  %v640_v8 = vpop.f32.mrb[3].mxu0  ;;  %p732_p5 = scmp.lt.s32.totalorder %s730_s15, %s724_s30 }
  0xfe   : > { %391 = vrot.lane.b32.xlu0 %v379_v4, %s856_s12  ;;  %p733_p6 = por %p732_p5, %p731_p4 }
 0x100   : > { %p734_p7 = pnand %p733_p6, %p727_p2 }
 0x16c   : > { %v389_v9 = vpop.permute.xlu0 %388 }
 0x16e   : > { %v407_v10 = vpop.permute.xlu1 %406 }
 0x16f   : > { %409 = vst.msk [vmem:[%s302_s26] sm:$0xf] %vm400_vm2, %v407_v10 }
 0x170   : > { %v392_v13 = vpop.permute.xlu0 %391 }
 0x171   : > { %737 = shalt.err (!%p734_p7)
}
 0x172   : > { %s738_s26 = scalar_lea.hbm %s986_s9, 64  ;;  %s742_s10 = scalar_lea.hbm %s1087_s5, 256 }
 0x173   : > { %p739_p9 = scmp.ne.s32.totalorder %s986_s9, %s738_s26  ;;  %p743_p12 = scmp.lt.u32.totalorder %s986_s9, %s1087_s5 }
 0x174   : > { %p744_p13 = scmp.lt.u32.totalorder %s742_s10, %s738_s26  ;;  %p746_p1 = scmp.lt.u32.totalorder %s738_s26, %s986_s9 }
 0x175   : > { %p740_p10 = pnand %p739_p9, %p940_p3 }
 0x176   : > { %p745_p0 = por %p744_p13, %p743_p12 }
 0x177   : > { %p741_p11 = pneg %p740_p10 }
 0x178   : > { %p747_p2 = por %p746_p1, %p745_p0 }
 0x17a   : > { %p748_p4 = pnand %p747_p2, %p741_p11 }
 0x17c   : > { %751 = shalt.err (!%p748_p4)
}
 0x17d   : > { %642 = dma.vmem_to_hbm [thread:$0]  (%p940_p3), %s988_s27, 64, %s986_s9, %s416_s14   ;;  %v395_v14 = vsel %vm394_vm3, %v389_v9, %v392_v13  ;;  %v386_v15 = vmul.f32 %v385_v11, %v379_v4 }
 0x17e   : > { %v397_v16 = vmul.f32 %v396_v12, %v395_v14  ;;  %s1092_s15 = sshll.u32 %s971_s13, 2  ;;  %s1093_s26 = sshll.u32 %s976_s16, 6 }
 0x17f   : > { %s295_s30 = scalar_lea.vmem [#allocation2], %s1092_s15  ;;  %s1027_s10 = scalar_lea.hbm %s1086_s4, %s1093_s26 }
 0x180   : > { %s432_s8 = sshll.u32 %s295_s30, 4  ;;  %v398_v17 = vadd.f32 %v397_v16, %v386_v15  ;;  %s411_s27 = scalar_lea.sflag [#allocation3], %s971_s13  ;;  %s1029_s8 = int_to_ptr.vmem [resolvable:$true] %s432_s8 }
 0x181   : > { %s752_s9 = scalar_lea.vmem %s1029_s8, 64  ;;  %s858_s14 = smov [#allocation2]  }
 0x182   : > { %v399_v18 = vpack.c.bf16 %v398_v17, %v398_v17  ;;  %p753_p5 = scmp.ne.s32.totalorder %s1029_s8, %s752_s9  ;;  %s756_s16 = sshll.u32 %s858_s14, 4  ;;  %s757_s16 = int_to_ptr.vmem [resolvable:$false] %s756_s16 }
 0x183   : > { %s758_s12 = scalar_lea.vmem %s757_s16, 128  ;;  %p759_p9 = scmp.lt.s32.totalorder %s1029_s8, %s757_s16 }
 0x184   : > { %401 = vst.msk [vmem:[%s295_s30] sm:$0xf] %vm400_vm2, %v399_v18  ;;  %p754_p6 = pnand %p753_p5, %p940_p3  ;;  %p760_p10 = scmp.lt.s32.totalorder %s758_s12, %s752_s9 }
 0x186   : > { %p755_p7 = pneg %p754_p6  ;;  %p761_p11 = por %p760_p10, %p759_p9 }
 0x188   : > { %p762_p12 = pnand %p761_p11, %p755_p7 }
 0x18a   : > { %765 = shalt.err (!%p762_p12)
}
 0x18b   : > { %s766_s13 = scalar_lea.hbm %s1027_s10, 64  ;;  %s770_s30 = scalar_lea.hbm %s1086_s4, 256 }
 0x18c   : > { %p767_p13 = scmp.ne.s32.totalorder %s1027_s10, %s766_s13  ;;  %p771_p2 = scmp.lt.u32.totalorder %s1027_s10, %s1086_s4 }
 0x18d   : > { %p772_p4 = scmp.lt.u32.totalorder %s770_s30, %s766_s13  ;;  %p774_p6 = scmp.lt.u32.totalorder %s766_s13, %s1027_s10 }
 0x18e   : > { %p768_p0 = pnand %p767_p13, %p940_p3 }
 0x18f   : > { %p773_p5 = por %p772_p4, %p771_p2 }
 0x190   : > { %p769_p1 = pneg %p768_p0 }
 0x191   : > { %p775_p7 = por %p774_p6, %p773_p5 }
 0x193   : > { %p776_p9 = pnand %p775_p7, %p769_p1 }
 0x195   : > { %779 = shalt.err (!%p776_p9)
}
 0x196   : > { %641 = dma.vmem_to_hbm [thread:$0]  (%p940_p3), %s1029_s8, 64, %s1027_s10, %s411_s27  }
 0x197 PF: > { %p652_p10 = scmp.ge.s32.totalorder %s850_s25, 2  ;;  %s460_s22 = sand.u32 1, %s822_s18  }
 0x198   : > { %s461_s9 = scalar_lea.sflag [#allocation3], %s460_s22 }
 0x199   : > { %p646_p11 = pnand %p652_p10, %p949_p8 }
 0x19b   : > { %813 = dma.done.wait (!%p646_p11), %s461_s9, 64  }
 0x19c   : > { %815 = vsyncadd (!%p646_p11), %s461_s9, 4294967232  ;;  %s470_s14 = scalar_lea.sflag [#allocation5], %s460_s22 }
 0x19d   : > { %817 = dma.done.wait (!%p646_p11), %s470_s14, 64  }
 0x19e   : > { %819 = vsyncadd (!%p646_p11), %s470_s14, 4294967232  ;;  %s22_s25 = sadd.s32 1, %s850_s25   ;;  %s1094_s18 = smov %s826_s19 }
 0x19f   : > { %p19_p12 = scmp.ge.s32.totalorder %s22_s25, 6   ;;  %s1095_s19 = smov %s830_s20 }
 0x1a0   : > { %s1096_s20 = smov %s958_s11  ;;  %s1097_s21 = smov %s842_s23 }
 0x1a1   : > { %s1098_s22 = smov %s846_s24  ;;  %s1099_s23 = smov %s1102_s28 }
 0x1a2   : > { %s1100_s24 = smov %s1106_s29  ;;  %21 = sbr.rel (!%p19_p12) target bundleno = 7 (0x7), region = 97 }
 0x1a9   :  { %475 = vsyncpa [#allocation3], 1 }
 0x1aa   :  { %477 = vsyncpa [#allocation3 + $0x1], 1 }
 0x1ab   :  { %478 = vsyncpa [#allocation5], 1 }
 0x1ac   :  { %480 = vsyncpa [#allocation5 + $0x1], 1 }

</bundles_post_ra>
